<compile_context>
chip_gen: v6e
topology: v6e:2x2x1
jax: 0.10.0
libtpu: 0.0.40
codegen_flags: <defaults>
</compile_context>

<pallas_src>
import jax
import jax.numpy as jnp
from jax.experimental import pallas as pl
from jax.experimental.pallas import tpu as pltpu

SUBLANE = 8    # TPU sublane width (second-to-last dim tiling)


def _round_up(x, m):
    return ((x + m - 1) // m) * m


def _vmem_capacity_bytes():
    try:
        return int(pltpu.get_tpu_info().vmem_capacity_bytes)
    except Exception:
        return 64 * 1024 * 1024   # conservative fallback (v7x per-TensorCore VMEM)


def cas_self_kernel(x_ref, w1_ref, b1_ref, w2_ref, b2_ref, o_ref):
    """o = x + (relu(x @ W1 + b1) @ W2 + b2) for one row tile (dropout = eval identity)."""
    x = x_ref[...]
    # MXU pass 1: [tm, F] @ [F, H] -> f32 [tm, H]; inputs at the weight dtype.
    h = jnp.dot(x.astype(w1_ref.dtype), w1_ref[...],
                preferred_element_type=jnp.float32)
    h = jnp.maximum(h + b1_ref[...], 0.0)          # bias + ReLU in f32 (VPU, v5e-safe)
    # MXU pass 2: [tm, H] @ [H, F] -> f32 [tm, F]
    y = jnp.dot(h.astype(w2_ref.dtype), w2_ref[...],
                preferred_element_type=jnp.float32)
    y = y + b2_ref[...]
    # Residual add in f32; only the final store casts to the output dtype.
    o_ref[...] = (x.astype(jnp.float32) + y).astype(o_ref.dtype)


def cas_self(x, w1, b1, w2, b2, *, row_tile=None, mxu_dtype=jnp.bfloat16,
             weight_buffers=1):
    """Residual MLP  x + Linear(ReLU(Linear(x)))  (dropout = identity / eval).

    x:  [N, F_in]      activations (f32 or bf16; bf16 halves x/out HBM traffic)
    w1: [F_in, hid]    first Linear weight (pre-transposed), hid = F_in // 2
    b1: [1, hid]
    w2: [hid, F_out]   second Linear weight (pre-transposed)
    b2: [1, F_out]
    mxu_dtype:      matmul-input dtype (default bf16; accumulation is always f32).
                    None keeps the incoming weight dtype (exact-f32 path).
    weight_buffers: VMEM buffers for the grid-constant weights/biases; 1 halves
                    their footprint. None -> Pallas default double buffering.
    """
    N, F_in = x.shape
    hid = w1.shape[1]
    F_out = w2.shape[1]
    assert F_out == F_in, "residual x + evolve(x) requires out_features == in_features"

    out_dtype = x.dtype

    if mxu_dtype is not None:
        w1 = w1.astype(mxu_dtype)
        w2 = w2.astype(mxu_dtype)
    b1 = b1.astype(jnp.float32)   # f32 epilogue
    b2 = b2.astype(jnp.float32)

    # Row tiling: target ~8 grid steps (>= 2 per v7x TensorCore), cap at 1024
    # rows, round to a sublane multiple. Ragged N handled by the cdiv grid +
    # masked writeback of the last partial block.
    if row_tile is None:
        row_tile = min(1024, max(SUBLANE, _round_up(pl.cdiv(N, 8), SUBLANE)))
    row_tile = _round_up(max(SUBLANE, min(row_tile, _round_up(N, SUBLANE))), SUBLANE)
    grid = (pl.cdiv(N, row_tile),)

    x_bytes = jnp.dtype(x.dtype).itemsize
    o_bytes = jnp.dtype(out_dtype).itemsize
    w_bytes = jnp.dtype(w1.dtype).itemsize

    flops = 2 * N * F_in * hid + 2 * N * hid * F_out
    bytes_accessed = (N * F_in * (x_bytes + o_bytes)                 # x in + out
                      + (F_in * hid + hid * F_out) * w_bytes         # weights
                      + (hid + F_out) * 4)                           # biases
    cost = pl.CostEstimate(flops=flops, transcendentals=0,
                           bytes_accessed=bytes_accessed)

    def build_and_run(n_weight_buffers):
        w_kwargs = {}
        if n_weight_buffers is not None:
            w_kwargs = dict(pipeline_mode=pl.Buffered(n_weight_buffers))
        n_wbuf = n_weight_buffers if n_weight_buffers is not None else 2

        # VMEM: double-buffered x/out row tiles + weight buffers + f32 intermediates.
        vmem_est = (2 * row_tile * F_in * (x_bytes + o_bytes)
                    + n_wbuf * ((F_in * hid + hid * F_out) * w_bytes
                                + (hid + F_out) * 4)
                    + row_tile * (hid + 2 * F_in) * 4)
        cap = int(0.75 * _vmem_capacity_bytes())     # ~96 MiB v5e/v6e, ~48 MiB v7x
        vmem_limit = min(cap, max(16 * 1024 * 1024, int(1.25 * vmem_est)))

        return pl.pallas_call(
            cas_self_kernel,
            out_shape=jax.ShapeDtypeStruct((N, F_in), out_dtype),
            grid_spec=pltpu.PrefetchScalarGridSpec(
                num_scalar_prefetch=0,
                grid=grid,
                in_specs=[
                    pl.BlockSpec((row_tile, F_in), lambda i: (i, 0)),          # x rows
                    pl.BlockSpec((F_in, hid), lambda i: (0, 0), **w_kwargs),   # W1 (resident)
                    pl.BlockSpec((1, hid), lambda i: (0, 0), **w_kwargs),      # b1
                    pl.BlockSpec((hid, F_out), lambda i: (0, 0), **w_kwargs),  # W2 (resident)
                    pl.BlockSpec((1, F_out), lambda i: (0, 0), **w_kwargs),    # b2
                ],
                out_specs=pl.BlockSpec((row_tile, F_in), lambda i: (i, 0)),
            ),
            compiler_params=pltpu.CompilerParams(
                dimension_semantics=("parallel",),
                vmem_limit_bytes=vmem_limit,
            ),
            cost_estimate=cost,
        )(x, w1, b1, w2, b2)

    if weight_buffers is None:
        return build_and_run(None)
    try:
        return build_and_run(weight_buffers)
    except Exception:
        # Installed JAX/Mosaic rejects single-buffered BlockSpecs -> fall back to
        # default double buffering (identical numerics, 2x weight VMEM).
        return build_and_run(None)


def reference(x, w1, b1, w2, b2):
    h = jnp.maximum(x @ w1 + b1, 0.0)
    return x + (h @ w2 + b2)


if __name__ == "__main__":
    # Shapes implied by the module: in_features = out_features (residual),
    # hidden = in_features // 2. N = 1024 -> auto row_tile = 128 -> 8 grid steps
    # (>= 2 pipelined steps per v7x TensorCore).
    N = 1024
    in_features = 32
    hidden = in_features // 2
    out_features = 32

    key = jax.random.PRNGKey(0)
    kx, k1, kb1, k2, kb2 = jax.random.split(key, 5)

    x = jax.random.normal(kx, (N, in_features), dtype=jnp.float32)
    # Linear weights stored pre-transposed: [F_in, F_out].
    w1 = jax.random.normal(k1, (in_features, hidden), dtype=jnp.float32) * 0.1
    b1 = jax.random.normal(kb1, (1, hidden), dtype=jnp.float32) * 0.01
    w2 = jax.random.normal(k2, (hidden, out_features), dtype=jnp.float32) * 0.1
    b2 = jax.random.normal(kb2, (1, out_features), dtype=jnp.float32) * 0.01

    ref = reference(x, w1, b1, w2, b2)

    # Default fast path: bf16 MXU inputs, f32 accumulation. bf16 rounding of the
    # matmul inputs changes numerics slightly -> relaxed tolerance (not a bug).
    out_bf16 = jax.block_until_ready(cas_self(x, w1, b1, w2, b2))
    assert out_bf16.shape == ref.shape
    assert jnp.allclose(out_bf16, ref, atol=5e-2, rtol=5e-2), "bf16 path mismatch"

    # Exact f32 path: tight tolerance vs the JAX reference.
    out_f32 = jax.block_until_ready(cas_self(x, w1, b1, w2, b2, mxu_dtype=None))
    assert out_f32.shape == ref.shape
    assert jnp.allclose(out_f32, ref, atol=1e-5, rtol=1e-5), "f32 path mismatch"

    print("KERNEL_OK")
</pallas_src>

<mosaic_0001>
module attributes {stable_mosaic.version = 11 : i64} {
  func.func @cas_self_kernel(%arg0: i32, %arg1: memref<128x32xf32, #tpu.memory_space<vmem>>, %arg2: memref<32x16xbf16, #tpu.memory_space<vmem>>, %arg3: memref<1x16xf32, #tpu.memory_space<vmem>>, %arg4: memref<16x32xbf16, #tpu.memory_space<vmem>>, %arg5: memref<1x32xf32, #tpu.memory_space<vmem>>, %arg6: memref<128x32xf32, #tpu.memory_space<vmem>>) attributes {dimension_semantics = [#tpu.dimension_semantics<parallel>], iteration_bounds = array<i64: 8>, scalar_prefetch = 0 : i64, scratch_operands = 0 : i64, tpu.core_type = #tpu.core_type<tc>, window_params = [{transform_indices = @transform_0, window_bounds = array<i64: 128, 32>}, {pipeline_mode = #tpu.pipeline_mode<synchronous>, transform_indices = @transform_1, window_bounds = array<i64: 32, 16>}, {pipeline_mode = #tpu.pipeline_mode<synchronous>, transform_indices = @transform_2, window_bounds = array<i64: 1, 16>}, {pipeline_mode = #tpu.pipeline_mode<synchronous>, transform_indices = @transform_3, window_bounds = array<i64: 16, 32>}, {pipeline_mode = #tpu.pipeline_mode<synchronous>, transform_indices = @transform_4, window_bounds = array<i64: 1, 32>}, {transform_indices = @transform_5, window_bounds = array<i64: 128, 32>}]} {
    %c0 = arith.constant 0 : index
    %c0_0 = arith.constant 0 : index
    %0 = vector.load %arg1[%c0, %c0_0] : memref<128x32xf32, #tpu.memory_space<vmem>>, vector<128x32xf32>
    %1 = arith.truncf %0 : vector<128x32xf32> to vector<128x32xbf16>
    %c0_1 = arith.constant 0 : index
    %c0_2 = arith.constant 0 : index
    %2 = vector.load %arg2[%c0_1, %c0_2] : memref<32x16xbf16, #tpu.memory_space<vmem>>, vector<32x16xbf16>
    %cst = arith.constant dense<0.000000e+00> : vector<128x16xf32>
    %3 = tpu.matmul %1, %2, %cst {dimension_numbers = #tpu.dot_dimension_numbers<[1], [0], [0], [1], [0, 0, 1, 1], [], []>} : vector<128x32xbf16>, vector<32x16xbf16>, vector<128x16xf32> -> vector<128x16xf32>
    %c0_3 = arith.constant 0 : index
    %c0_4 = arith.constant 0 : index
    %4 = vector.load %arg3[%c0_3, %c0_4] : memref<1x16xf32, #tpu.memory_space<vmem>>, vector<1x16xf32>
    %5 = vector.broadcast %4 : vector<1x16xf32> to vector<128x16xf32>
    %6 = arith.addf %3, %5 : vector<128x16xf32>
    %cst_5 = arith.constant 0.000000e+00 : f32
    %7 = vector.broadcast %cst_5 : f32 to vector<128x16xf32>
    %8 = arith.maximumf %6, %7 : vector<128x16xf32>
    %9 = arith.truncf %8 : vector<128x16xf32> to vector<128x16xbf16>
    %c0_6 = arith.constant 0 : index
    %c0_7 = arith.constant 0 : index
    %10 = vector.load %arg4[%c0_6, %c0_7] : memref<16x32xbf16, #tpu.memory_space<vmem>>, vector<16x32xbf16>
    %cst_8 = arith.constant dense<0.000000e+00> : vector<128x32xf32>
    %11 = tpu.matmul %9, %10, %cst_8 {dimension_numbers = #tpu.dot_dimension_numbers<[1], [0], [0], [1], [0, 0, 1, 1], [], []>} : vector<128x16xbf16>, vector<16x32xbf16>, vector<128x32xf32> -> vector<128x32xf32>
    %c0_9 = arith.constant 0 : index
    %c0_10 = arith.constant 0 : index
    %12 = vector.load %arg5[%c0_9, %c0_10] : memref<1x32xf32, #tpu.memory_space<vmem>>, vector<1x32xf32>
    %13 = vector.broadcast %12 : vector<1x32xf32> to vector<128x32xf32>
    %14 = arith.addf %11, %13 : vector<128x32xf32>
    %15 = arith.addf %0, %14 : vector<128x32xf32>
    %c0_11 = arith.constant 0 : index
    %c0_12 = arith.constant 0 : index
    %16 = vector.load %arg6[%c0_11, %c0_12] : memref<128x32xf32, #tpu.memory_space<vmem>>, vector<128x32xf32>
    tpu.vector_store %arg6[%c0_11, %c0_12], %15 {strides = array<i32>} : memref<128x32xf32, #tpu.memory_space<vmem>>, vector<128x32xf32>,
    return
  }
  func.func @transform_0(%arg0: i32) -> (i32, i32) {
    %c0_i32 = arith.constant 0 : i32
    %c0_i32_0 = arith.constant 0 : i32
    return %arg0, %c0_i32 : i32, i32
  }
  func.func @transform_1(%arg0: i32) -> (i32, i32) {
    %c0_i32 = arith.constant 0 : i32
    %c0_i32_0 = arith.constant 0 : i32
    %c0_i32_1 = arith.constant 0 : i32
    return %c0_i32, %c0_i32_0 : i32, i32
  }
  func.func @transform_2(%arg0: i32) -> (i32, i32) {
    %c0_i32 = arith.constant 0 : i32
    %c0_i32_0 = arith.constant 0 : i32
    %c0_i32_1 = arith.constant 0 : i32
    return %c0_i32, %c0_i32_0 : i32, i32
  }
  func.func @transform_3(%arg0: i32) -> (i32, i32) {
    %c0_i32 = arith.constant 0 : i32
    %c0_i32_0 = arith.constant 0 : i32
    %c0_i32_1 = arith.constant 0 : i32
    return %c0_i32, %c0_i32_0 : i32, i32
  }
  func.func @transform_4(%arg0: i32) -> (i32, i32) {
    %c0_i32 = arith.constant 0 : i32
    %c0_i32_0 = arith.constant 0 : i32
    %c0_i32_1 = arith.constant 0 : i32
    return %c0_i32, %c0_i32_0 : i32, i32
  }
  func.func @transform_5(%arg0: i32) -> (i32, i32) {
    %c0_i32 = arith.constant 0 : i32
    %c0_i32_0 = arith.constant 0 : i32
    return %arg0, %c0_i32 : i32, i32
  }
}

module attributes {stable_mosaic.version = 11 : i64} {
  func.func @cas_self_kernel(%arg0: i32, %arg1: memref<128x32xf32, #tpu.memory_space<vmem>>, %arg2: memref<32x16xbf16, #tpu.memory_space<vmem>>, %arg3: memref<1x16xf32, #tpu.memory_space<vmem>>, %arg4: memref<16x32xbf16, #tpu.memory_space<vmem>>, %arg5: memref<1x32xf32, #tpu.memory_space<vmem>>, %arg6: memref<128x32xf32, #tpu.memory_space<vmem>>) attributes {dimension_semantics = [#tpu.dimension_semantics<parallel>], iteration_bounds = array<i64: 8>, scalar_prefetch = 0 : i64, scratch_operands = 0 : i64, tpu.core_type = #tpu.core_type<tc>, window_params = [{transform_indices = @transform_0, window_bounds = array<i64: 128, 32>}, {pipeline_mode = #tpu.pipeline_mode<synchronous>, transform_indices = @transform_1, window_bounds = array<i64: 32, 16>}, {pipeline_mode = #tpu.pipeline_mode<synchronous>, transform_indices = @transform_2, window_bounds = array<i64: 1, 16>}, {pipeline_mode = #tpu.pipeline_mode<synchronous>, transform_indices = @transform_3, window_bounds = array<i64: 16, 32>}, {pipeline_mode = #tpu.pipeline_mode<synchronous>, transform_indices = @transform_4, window_bounds = array<i64: 1, 32>}, {transform_indices = @transform_5, window_bounds = array<i64: 128, 32>}]} {
    %c0 = arith.constant 0 : index
    %c0_0 = arith.constant 0 : index
    %0 = vector.load %arg1[%c0, %c0_0] : memref<128x32xf32, #tpu.memory_space<vmem>>, vector<128x32xf32>
    %1 = arith.truncf %0 : vector<128x32xf32> to vector<128x32xbf16>
    %c0_1 = arith.constant 0 : index
    %c0_2 = arith.constant 0 : index
    %2 = vector.load %arg2[%c0_1, %c0_2] : memref<32x16xbf16, #tpu.memory_space<vmem>>, vector<32x16xbf16>
    %cst = arith.constant dense<0.000000e+00> : vector<128x16xf32>
    %3 = tpu.matmul %1, %2, %cst {dimension_numbers = #tpu.dot_dimension_numbers<[1], [0], [0], [1], [0, 0, 1, 1], [], []>} : vector<128x32xbf16>, vector<32x16xbf16>, vector<128x16xf32> -> vector<128x16xf32>
    %c0_3 = arith.constant 0 : index
    %c0_4 = arith.constant 0 : index
    %4 = vector.load %arg3[%c0_3, %c0_4] : memref<1x16xf32, #tpu.memory_space<vmem>>, vector<1x16xf32>
    %5 = vector.broadcast %4 : vector<1x16xf32> to vector<128x16xf32>
    %6 = arith.addf %3, %5 : vector<128x16xf32>
    %cst_5 = arith.constant 0.000000e+00 : f32
    %7 = vector.broadcast %cst_5 : f32 to vector<128x16xf32>
    %8 = arith.maximumf %6, %7 : vector<128x16xf32>
    %9 = arith.truncf %8 : vector<128x16xf32> to vector<128x16xbf16>
    %c0_6 = arith.constant 0 : index
    %c0_7 = arith.constant 0 : index
    %10 = vector.load %arg4[%c0_6, %c0_7] : memref<16x32xbf16, #tpu.memory_space<vmem>>, vector<16x32xbf16>
    %cst_8 = arith.constant dense<0.000000e+00> : vector<128x32xf32>
    %11 = tpu.matmul %9, %10, %cst_8 {dimension_numbers = #tpu.dot_dimension_numbers<[1], [0], [0], [1], [0, 0, 1, 1], [], []>} : vector<128x16xbf16>, vector<16x32xbf16>, vector<128x32xf32> -> vector<128x32xf32>
    %c0_9 = arith.constant 0 : index
    %c0_10 = arith.constant 0 : index
    %12 = vector.load %arg5[%c0_9, %c0_10] : memref<1x32xf32, #tpu.memory_space<vmem>>, vector<1x32xf32>
    %13 = vector.broadcast %12 : vector<1x32xf32> to vector<128x32xf32>
    %14 = arith.addf %11, %13 : vector<128x32xf32>
    %15 = arith.addf %0, %14 : vector<128x32xf32>
    %c0_11 = arith.constant 0 : index
    %c0_12 = arith.constant 0 : index
    %16 = vector.load %arg6[%c0_11, %c0_12] : memref<128x32xf32, #tpu.memory_space<vmem>>, vector<128x32xf32>
    tpu.vector_store %arg6[%c0_11, %c0_12], %15 {strides = array<i32>} : memref<128x32xf32, #tpu.memory_space<vmem>>, vector<128x32xf32>,
    return
  }
  func.func @transform_0(%arg0: i32) -> (i32, i32) {
    %c0_i32 = arith.constant 0 : i32
    %c0_i32_0 = arith.constant 0 : i32
    return %arg0, %c0_i32 : i32, i32
  }
  func.func @transform_1(%arg0: i32) -> (i32, i32) {
    %c0_i32 = arith.constant 0 : i32
    %c0_i32_0 = arith.constant 0 : i32
    %c0_i32_1 = arith.constant 0 : i32
    return %c0_i32, %c0_i32_0 : i32, i32
  }
  func.func @transform_2(%arg0: i32) -> (i32, i32) {
    %c0_i32 = arith.constant 0 : i32
    %c0_i32_0 = arith.constant 0 : i32
    %c0_i32_1 = arith.constant 0 : i32
    return %c0_i32, %c0_i32_0 : i32, i32
  }
  func.func @transform_3(%arg0: i32) -> (i32, i32) {
    %c0_i32 = arith.constant 0 : i32
    %c0_i32_0 = arith.constant 0 : i32
    %c0_i32_1 = arith.constant 0 : i32
    return %c0_i32, %c0_i32_0 : i32, i32
  }
  func.func @transform_4(%arg0: i32) -> (i32, i32) {
    %c0_i32 = arith.constant 0 : i32
    %c0_i32_0 = arith.constant 0 : i32
    %c0_i32_1 = arith.constant 0 : i32
    return %c0_i32, %c0_i32_0 : i32, i32
  }
  func.func @transform_5(%arg0: i32) -> (i32, i32) {
    %c0_i32 = arith.constant 0 : i32
    %c0_i32_0 = arith.constant 0 : i32
    return %arg0, %c0_i32 : i32, i32
  }
}

</mosaic_0001>

<bundles_post_ra>
// kernel: tpu_custom_call.1
= control target key start
LH: loop header
LB: loop body
LE: loop exit
PB: predicated region body
PF: predicated region fallthrough
CT: control target
= control target key end

     0   :  { %s785_s18 = smov 0   ;;  %s956_s0 = inlined_call_operand.vmem [shape: f32[1024,32], index: 0, kind: input, shape index: {}]   ;;  %s957_s1 = inlined_call_operand.vmem [shape: bf16[32,16], index: 1, kind: input, shape index: {}]   ;;  %s958_s2 = inlined_call_operand.vmem [shape: f32[1,16], index: 2, kind: input, shape index: {}]   ;;  %s959_s3 = inlined_call_operand.vmem [shape: bf16[16,32], index: 3, kind: input, shape index: {}]   ;;  %s960_s4 = inlined_call_operand.vmem [shape: f32[1,32], index: 4, kind: input, shape index: {}]   ;;  %s961_s5 = inlined_call_operand.vmem [shape: f32[1024,32], index: 5, kind: output, shape index: {}]  }
   0x1 LB: > { %s647_s19 = sadd.s32 4294967295, %s753_s18   ;;  %p651_p0 = scmp.ge.s32.totalorder %s753_s18, 1  ;;  %s753_s18 = sphi %s785_s18, %s15_s18  }
   0x2   : > { %p188_p1 = scmp.lt.s32.totalorder %s753_s18, 9 }
   0x4   : > { %p189_p2 = pnand %p651_p0, %p188_p1 }
   0x5   : > { %s652_s22 = sshll.u32 (!%p189_p2), %s647_s19, 4 }
   0x6   : > { %192 = sbr.rel (%p189_p2) target bundleno = 454 (0x1c6), region = 40  ;;  %p217_p3 = scmp.lt.s32.totalorder (!%p189_p2), %s652_s22, 127 }
   0xb   : > { %v744_v0 = vld [vmem:[%s957_s1 + $0x8] sm:$0xff]   ;;  %v745_v1 = vld [vmem:[%s957_s1] sm:$0xff]   ;;  %s963_s22 = smov (!%p217_p3, %s652_s22), 127  ;;  %vm276_vm0 = vcmask 261120   ;;  %vm437_vm1 = vcmask 130048  }
   0xc   : > { %698 = vmatprep.subr.bf16.mxu0 %v744_v0  ;;  %s653_s25 = sshll.u32 %s963_s22, 3  ;;  %v746_v26 = vld [vmem:[%s959_s3] sm:$0xff]  }
   0xd   : > { %699 = vmatpush3.bf16.msra.mxu0 %v744_v0  ;;  %s807_s28 = scalar_lea.vmem %s956_s0, %s653_s25  ;;  %718 = vmatprep.subr.bf16.mxu1 %v746_v26  ;;  %v656_v29 = vld [vmem:[%s958_s2] ss:$0 sm:$0xff]  ;;  %s903_s12 = scalar_lea.vmem %s961_s5, %s653_s25 }
   0xe   : > { %700 = vmatprep.subr.bf16.mxu0 %v745_v1  ;;  %v810_v2 = vld [vmem:[%s807_s28] sm:$0xff]  ;;  %v813_v3 = vld [vmem:[%s807_s28 + $0x8] sm:$0xff]  ;;  %v816_v4 = vld [vmem:[%s807_s28 + $0x10] sm:$0xff]  ;;  %719 = vmatpush3.bf16.msra.mxu1 %v746_v26 }
   0xf   : > { %v245_v5 = vpack.c.bf16 %v813_v3, %v810_v2  ;;  %v821_v6 = vld [vmem:[%s807_s28 + $0x18] sm:$0xff]  ;;  %v824_v7 = vld [vmem:[%s807_s28 + $0x20] sm:$0xff]  ;;  %v827_v8 = vld [vmem:[%s807_s28 + $0x28] sm:$0xff] }
  0x10   : > { %v246_v9 = vpack.c.bf16 %v821_v6, %v816_v4  ;;  %v247_v10 = vpack.c.bf16 %v827_v8, %v824_v7  ;;  %v837_v11 = vld [vmem:[%s807_s28 + $0x30] sm:$0xff]  ;;  %v840_v12 = vld [vmem:[%s807_s28 + $0x38] sm:$0xff]  ;;  %v843_v13 = vld [vmem:[%s807_s28 + $0x40] sm:$0xff] }
  0x11   : > { %701 = vmatpush3.bf16.msra.mxu0 %v745_v1  ;;  %702 = vmatprep.mubr.msk.bf16.mxu0 %vm276_vm0, %v245_v5  ;;  %v846_v14 = vld [vmem:[%s807_s28 + $0x48] sm:$0xff]  ;;  %v248_v15 = vpack.c.bf16 %v840_v12, %v837_v11  ;;  %v855_v17 = vld [vmem:[%s807_s28 + $0x50] sm:$0xff]  ;;  %v858_v18 = vld [vmem:[%s807_s28 + $0x58] sm:$0xff] }
  0x12   : > { %v249_v16 = vpack.c.bf16 %v846_v14, %v843_v13  ;;  %v861_v19 = vld [vmem:[%s807_s28 + $0x60] sm:$0xff]  ;;  %v864_v20 = vld [vmem:[%s807_s28 + $0x68] sm:$0xff]  ;;  %v250_v21 = vpack.c.bf16 %v858_v18, %v855_v17  ;;  %v873_v23 = vld [vmem:[%s807_s28 + $0x70] sm:$0xff] }
  0x13   : > { %v251_v22 = vpack.c.bf16 %v864_v20, %v861_v19  ;;  %v876_v24 = vld [vmem:[%s807_s28 + $0x78] sm:$0xff] }
  0x14   : > { %703 = vmatmul.mubr.msk.bf16.vlgmr.msra.gmra.mxu0 %vm276_vm0, %v246_v9  ;;  %v252_v25 = vpack.c.bf16 %v876_v24, %v873_v23 }
  0x15   : > { %706 = vmatprep.mubr.msk.bf16.mxu0 %vm276_vm0, %v247_v10 }
  0x1c   : > { %707 = vmatmul.mubr.msk.bf16.gmra.mxu0 %vm276_vm0, %v248_v15 }
  0x1d   : > { %710 = vmatprep.mubr.msk.bf16.mxu0 %vm276_vm0, %v249_v16 }
  0x24   : > { %711 = vmatmul.mubr.msk.bf16.gmra.mxu0 %vm276_vm0, %v250_v21 }
  0x25   : > { %714 = vmatprep.mubr.msk.bf16.mxu0 %vm276_vm0, %v251_v22 }
  0x2c   : > { %715 = vmatmul.mubr.msk.bf16.gmra.mxu0 %vm276_vm0, %v252_v25 }
  0xd4   : > { %v704_v27 = vpop.f32.mrf.mxu0 }
  0xd5   : > { %v344_v33 = vadd.f32 %v704_v27, %v656_v29 }
  0xd6   : > { %v335_v28 = vpop.f32.mrf.mxu0 }
  0xd7   : > { %v336_v31 = vadd.f32 %v656_v29, %v335_v28  ;;  %v400_v40 = vmax.f32 %v344_v33, 0.0 }
  0xd8   : > { %v705_v30 = vpop.f32.mrf.mxu0 }
  0xd9   : > { %v347_v32 = vadd.f32 %v705_v30, %v656_v29  ;;  %v398_v38 = vmax.f32 %v336_v31, 0.0 }
  0xda   : > { %v338_v34 = vpop.f32.mrf.mxu0 }
  0xdb   : > { %v339_v35 = vadd.f32 %v656_v29, %v338_v34  ;;  %v401_v36 = vmax.f32 %v347_v32, 0.0 }
  0xdc   : > { %v708_v37 = vpop.f32.mrf.mxu0 }
  0xdd   : > { %v399_v39 = vmax.f32 %v339_v35, 0.0  ;;  %v415_v43 = vpack.c.bf16 %v401_v36, %v400_v40  ;;  %v360_v47 = vadd.f32 %v708_v37, %v656_v29  ;;  %v667_v37 = vld [vmem:[%s960_s4] ss:$0 sm:$0xff] }
  0xde   : > { %v351_v41 = vpop.f32.mrf.mxu0 }
  0xdf   : > { %v414_v42 = vpack.c.bf16 %v399_v39, %v398_v38  ;;  %v352_v45 = vadd.f32 %v656_v29, %v351_v41  ;;  %v404_v54 = vmax.f32 %v360_v47, 0.0 }
  0xe0   : > { %v709_v44 = vpop.f32.mrf.mxu0 }
  0xe1   : > { %v363_v46 = vadd.f32 %v709_v44, %v656_v29  ;;  %720 = vmatprep.mubr.msk.bf16.mxu1 %vm437_vm1, %v414_v42  ;;  %v402_v52 = vmax.f32 %v352_v45, 0.0 }
  0xe2   : > { %v354_v48 = vpop.f32.mrf.mxu0  ;;  %721 = vmatmul.mubr.msk.bf16.vlgmr.msra.gmra.mxu1 %vm437_vm1, %v415_v43 }
  0xe3   : > { %v355_v49 = vadd.f32 %v656_v29, %v354_v48  ;;  %v405_v50 = vmax.f32 %v363_v46, 0.0 }
  0xe4   : > { %v712_v51 = vpop.f32.mrf.mxu0 }
  0xe5   : > { %v403_v53 = vmax.f32 %v355_v49, 0.0  ;;  %v417_v57 = vpack.c.bf16 %v405_v50, %v404_v54  ;;  %v376_v61 = vadd.f32 %v712_v51, %v656_v29 }
  0xe6   : > { %v367_v55 = vpop.f32.mrf.mxu0 }
  0xe7   : > { %v416_v56 = vpack.c.bf16 %v403_v53, %v402_v52  ;;  %v368_v59 = vadd.f32 %v656_v29, %v367_v55  ;;  %v408_v10 = vmax.f32 %v376_v61, 0.0 }
  0xe8   : > { %v713_v58 = vpop.f32.mrf.mxu0 }
  0xe9   : > { %v379_v60 = vadd.f32 %v713_v58, %v656_v29  ;;  %724 = vmatprep.mubr.msk.bf16.mxu1 %vm437_vm1, %v416_v56  ;;  %v406_v5 = vmax.f32 %v368_v59, 0.0 }
  0xea   : > { %v370_v62 = vpop.f32.mrf.mxu0  ;;  %725 = vmatmul.mubr.msk.bf16.gmra.mxu1 %vm437_vm1, %v417_v57 }
  0xeb   : > { %v371_v63 = vadd.f32 %v656_v29, %v370_v62  ;;  %v409_v0 = vmax.f32 %v379_v60, 0.0 }
  0xec   : > { %v716_v1 = vpop.f32.mrf.mxu0 }
  0xed   : > { %v407_v9 = vmax.f32 %v371_v63, 0.0  ;;  %v419_v21 = vpack.c.bf16 %v409_v0, %v408_v10  ;;  %v392_v27 = vadd.f32 %v716_v1, %v656_v29 }
  0xee   : > { %v383_v15 = vpop.f32.mrf.mxu0 }
  0xef   : > { %v418_v16 = vpack.c.bf16 %v407_v9, %v406_v5  ;;  %v384_v25 = vadd.f32 %v656_v29, %v383_v15  ;;  %v412_v34 = vmax.f32 %v392_v27, 0.0 }
  0xf0   : > { %v717_v22 = vpop.f32.mrf.mxu0 }
  0xf1   : > { %v395_v26 = vadd.f32 %v717_v22, %v656_v29  ;;  %728 = vmatprep.mubr.msk.bf16.mxu1 %vm437_vm1, %v418_v16  ;;  %v410_v32 = vmax.f32 %v384_v25, 0.0 }
  0xf2   : > { %v386_v28 = vpop.f32.mrf.mxu0  ;;  %729 = vmatmul.mubr.msk.bf16.gmra.mxu1 %vm437_vm1, %v419_v21 }
  0xf3   : > { %v387_v30 = vadd.f32 %v656_v29, %v386_v28  ;;  %v413_v31 = vmax.f32 %v395_v26, 0.0 }
  0xf5   : > { %v411_v33 = vmax.f32 %v387_v30, 0.0  ;;  %v421_v36 = vpack.c.bf16 %v413_v31, %v412_v34 }
  0xf7   : > { %v420_v35 = vpack.c.bf16 %v411_v33, %v410_v32 }
  0xf9   : > { %732 = vmatprep.mubr.msk.bf16.mxu1 %vm437_vm1, %v420_v35 }
  0xfa   : > { %733 = vmatmul.mubr.msk.bf16.gmra.mxu1 %vm437_vm1, %v421_v36 }
 0x1a2   : > { %v722_v38 = vpop.f32.mrf.mxu1 }
 0x1a3   : > { %v505_v39 = vadd.f32 %v722_v38, %v667_v37 }
 0x1a4   : > { %v496_v29 = vpop.f32.mrf.mxu1 }
 0x1a5   : > { %v561_v40 = vadd.f32 %v505_v39, %v816_v4  ;;  %v497_v41 = vadd.f32 %v667_v37, %v496_v29 }
 0x1a6   : > { %v723_v42 = vpop.f32.mrf.mxu1 }
 0x1a7   : > { %577 = vst.msk [vmem:[%s903_s12 + $0x10] sm:$0xff] %vm276_vm0, %v561_v40  ;;  %v559_v43 = vadd.f32 %v497_v41, %v810_v2  ;;  %v508_v44 = vadd.f32 %v723_v42, %v667_v37 }
 0x1a8   : > { %v499_v45 = vpop.f32.mrf.mxu1 }
 0x1a9   : > { %575 = vst.msk [vmem:[%s903_s12] sm:$0xff] %vm276_vm0, %v559_v43  ;;  %v562_v46 = vadd.f32 %v508_v44, %v821_v6  ;;  %v500_v47 = vadd.f32 %v667_v37, %v499_v45 }
 0x1aa   : > { %v726_v48 = vpop.f32.mrf.mxu1 }
 0x1ab   : > { %578 = vst.msk [vmem:[%s903_s12 + $0x18] sm:$0xff] %vm276_vm0, %v562_v46  ;;  %v560_v4 = vadd.f32 %v500_v47, %v813_v3  ;;  %v521_v49 = vadd.f32 %v726_v48, %v667_v37 }
 0x1ac   : > { %v512_v50 = vpop.f32.mrf.mxu1 }
 0x1ad   : > { %576 = vst.msk [vmem:[%s903_s12 + $0x8] sm:$0xff] %vm276_vm0, %v560_v4  ;;  %v565_v2 = vadd.f32 %v521_v49, %v837_v11  ;;  %v513_v51 = vadd.f32 %v667_v37, %v512_v50 }
 0x1ae   : > { %v727_v52 = vpop.f32.mrf.mxu1 }
 0x1af   : > { %581 = vst.msk [vmem:[%s903_s12 + $0x30] sm:$0xff] %vm276_vm0, %v565_v2  ;;  %v563_v6 = vadd.f32 %v513_v51, %v824_v7  ;;  %v524_v53 = vadd.f32 %v727_v52, %v667_v37 }
 0x1b0   : > { %v515_v54 = vpop.f32.mrf.mxu1 }
 0x1b1   : > { %579 = vst.msk [vmem:[%s903_s12 + $0x20] sm:$0xff] %vm276_vm0, %v563_v6  ;;  %v566_v3 = vadd.f32 %v524_v53, %v840_v12  ;;  %v516_v55 = vadd.f32 %v667_v37, %v515_v54 }
 0x1b2   : > { %v730_v56 = vpop.f32.mrf.mxu1 }
 0x1b3   : > { %582 = vst.msk [vmem:[%s903_s12 + $0x38] sm:$0xff] %vm276_vm0, %v566_v3  ;;  %v564_v11 = vadd.f32 %v516_v55, %v827_v8  ;;  %v537_v57 = vadd.f32 %v730_v56, %v667_v37 }
 0x1b4   : > { %v528_v58 = vpop.f32.mrf.mxu1 }
 0x1b5   : > { %580 = vst.msk [vmem:[%s903_s12 + $0x28] sm:$0xff] %vm276_vm0, %v564_v11  ;;  %v569_v7 = vadd.f32 %v537_v57, %v855_v17  ;;  %v529_v59 = vadd.f32 %v667_v37, %v528_v58 }
 0x1b6   : > { %v731_v60 = vpop.f32.mrf.mxu1 }
 0x1b7   : > { %585 = vst.msk [vmem:[%s903_s12 + $0x50] sm:$0xff] %vm276_vm0, %v569_v7  ;;  %v567_v12 = vadd.f32 %v529_v59, %v843_v13  ;;  %v540_v61 = vadd.f32 %v731_v60, %v667_v37 }
 0x1b8   : > { %v531_v62 = vpop.f32.mrf.mxu1 }
 0x1b9   : > { %583 = vst.msk [vmem:[%s903_s12 + $0x40] sm:$0xff] %vm276_vm0, %v567_v12  ;;  %v570_v8 = vadd.f32 %v540_v61, %v858_v18  ;;  %v532_v63 = vadd.f32 %v667_v37, %v531_v62 }
 0x1ba   : > { %v734_v0 = vpop.f32.mrf.mxu1 }
 0x1bb   : > { %586 = vst.msk [vmem:[%s903_s12 + $0x58] sm:$0xff] %vm276_vm0, %v570_v8  ;;  %v568_v17 = vadd.f32 %v532_v63, %v846_v14  ;;  %v553_v1 = vadd.f32 %v734_v0, %v667_v37 }
 0x1bc   : > { %v544_v5 = vpop.f32.mrf.mxu1 }
 0x1bd   : > { %584 = vst.msk [vmem:[%s903_s12 + $0x48] sm:$0xff] %vm276_vm0, %v568_v17  ;;  %v573_v13 = vadd.f32 %v553_v1, %v873_v23  ;;  %v545_v9 = vadd.f32 %v667_v37, %v544_v5 }
 0x1be   : > { %v735_v10 = vpop.f32.mrf.mxu1 }
 0x1bf   : > { %589 = vst.msk [vmem:[%s903_s12 + $0x70] sm:$0xff] %vm276_vm0, %v573_v13  ;;  %v571_v18 = vadd.f32 %v545_v9, %v861_v19  ;;  %v556_v15 = vadd.f32 %v735_v10, %v667_v37 }
 0x1c0   : > { %v547_v16 = vpop.f32.mrf.mxu1 }
 0x1c1   : > { %587 = vst.msk [vmem:[%s903_s12 + $0x60] sm:$0xff] %vm276_vm0, %v571_v18  ;;  %v574_v21 = vadd.f32 %v556_v15, %v876_v24  ;;  %v548_v14 = vadd.f32 %v667_v37, %v547_v16 }
 0x1c3   : > { %590 = vst.msk [vmem:[%s903_s12 + $0x78] sm:$0xff] %vm276_vm0, %v574_v21  ;;  %v572_v22 = vadd.f32 %v548_v14, %v864_v20 }
 0x1c5   : > { %588 = vst.msk [vmem:[%s903_s12 + $0x68] sm:$0xff] %vm276_vm0, %v572_v22 }
 0x1c6 PF: > { %s15_s18 = sadd.s32 1, %s753_s18  }
 0x1c7   : > { %p12_p4 = scmp.ge.s32.totalorder %s15_s18, 10  }
 0x1c9   :  { %14 = sbr.rel (!%p12_p4) target bundleno = 1 (0x1), region = 70 }

// kernel: tpu_custom_call.1
= control target key start
LH: loop header
LB: loop body
LE: loop exit
PB: predicated region body
PF: predicated region fallthrough
CT: control target
= control target key end

     0   :  { %s785_s18 = smov 0   ;;  %s956_s0 = inlined_call_operand.vmem [shape: f32[1024,32], index: 0, kind: input, shape index: {}]   ;;  %s957_s1 = inlined_call_operand.vmem [shape: bf16[32,16], index: 1, kind: input, shape index: {}]   ;;  %s958_s2 = inlined_call_operand.vmem [shape: f32[1,16], index: 2, kind: input, shape index: {}]   ;;  %s959_s3 = inlined_call_operand.vmem [shape: bf16[16,32], index: 3, kind: input, shape index: {}]   ;;  %s960_s4 = inlined_call_operand.vmem [shape: f32[1,32], index: 4, kind: input, shape index: {}]   ;;  %s961_s5 = inlined_call_operand.vmem [shape: f32[1024,32], index: 5, kind: output, shape index: {}]  }
   0x1 LB: > { %s647_s19 = sadd.s32 4294967295, %s753_s18   ;;  %p651_p0 = scmp.ge.s32.totalorder %s753_s18, 1  ;;  %s753_s18 = sphi %s785_s18, %s15_s18  }
   0x2   : > { %p188_p1 = scmp.lt.s32.totalorder %s753_s18, 9 }
   0x4   : > { %p189_p2 = pnand %p651_p0, %p188_p1 }
   0x5   : > { %s652_s22 = sshll.u32 (!%p189_p2), %s647_s19, 4 }
   0x6   : > { %192 = sbr.rel (%p189_p2) target bundleno = 454 (0x1c6), region = 40  ;;  %p217_p3 = scmp.lt.s32.totalorder (!%p189_p2), %s652_s22, 127 }
   0xb   : > { %v744_v0 = vld [vmem:[%s957_s1 + $0x8] sm:$0xff]   ;;  %v745_v1 = vld [vmem:[%s957_s1] sm:$0xff]   ;;  %s963_s22 = smov (!%p217_p3, %s652_s22), 127  ;;  %vm276_vm0 = vcmask 261120   ;;  %vm437_vm1 = vcmask 130048  }
   0xc   : > { %698 = vmatprep.subr.bf16.mxu0 %v744_v0  ;;  %s653_s25 = sshll.u32 %s963_s22, 3  ;;  %v746_v26 = vld [vmem:[%s959_s3] sm:$0xff]  }
   0xd   : > { %699 = vmatpush3.bf16.msra.mxu0 %v744_v0  ;;  %s807_s28 = scalar_lea.vmem %s956_s0, %s653_s25  ;;  %718 = vmatprep.subr.bf16.mxu1 %v746_v26  ;;  %v656_v29 = vld [vmem:[%s958_s2] ss:$0 sm:$0xff]  ;;  %s903_s12 = scalar_lea.vmem %s961_s5, %s653_s25 }
   0xe   : > { %700 = vmatprep.subr.bf16.mxu0 %v745_v1  ;;  %v810_v2 = vld [vmem:[%s807_s28] sm:$0xff]  ;;  %v813_v3 = vld [vmem:[%s807_s28 + $0x8] sm:$0xff]  ;;  %v816_v4 = vld [vmem:[%s807_s28 + $0x10] sm:$0xff]  ;;  %719 = vmatpush3.bf16.msra.mxu1 %v746_v26 }
   0xf   : > { %v245_v5 = vpack.c.bf16 %v813_v3, %v810_v2  ;;  %v821_v6 = vld [vmem:[%s807_s28 + $0x18] sm:$0xff]  ;;  %v824_v7 = vld [vmem:[%s807_s28 + $0x20] sm:$0xff]  ;;  %v827_v8 = vld [vmem:[%s807_s28 + $0x28] sm:$0xff] }
  0x10   : > { %v246_v9 = vpack.c.bf16 %v821_v6, %v816_v4  ;;  %v247_v10 = vpack.c.bf16 %v827_v8, %v824_v7  ;;  %v837_v11 = vld [vmem:[%s807_s28 + $0x30] sm:$0xff]  ;;  %v840_v12 = vld [vmem:[%s807_s28 + $0x38] sm:$0xff]  ;;  %v843_v13 = vld [vmem:[%s807_s28 + $0x40] sm:$0xff] }
  0x11   : > { %701 = vmatpush3.bf16.msra.mxu0 %v745_v1  ;;  %702 = vmatprep.mubr.msk.bf16.mxu0 %vm276_vm0, %v245_v5  ;;  %v846_v14 = vld [vmem:[%s807_s28 + $0x48] sm:$0xff]  ;;  %v248_v15 = vpack.c.bf16 %v840_v12, %v837_v11  ;;  %v855_v17 = vld [vmem:[%s807_s28 + $0x50] sm:$0xff]  ;;  %v858_v18 = vld [vmem:[%s807_s28 + $0x58] sm:$0xff] }
  0x12   : > { %v249_v16 = vpack.c.bf16 %v846_v14, %v843_v13  ;;  %v861_v19 = vld [vmem:[%s807_s28 + $0x60] sm:$0xff]  ;;  %v864_v20 = vld [vmem:[%s807_s28 + $0x68] sm:$0xff]  ;;  %v250_v21 = vpack.c.bf16 %v858_v18, %v855_v17  ;;  %v873_v23 = vld [vmem:[%s807_s28 + $0x70] sm:$0xff] }
  0x13   : > { %v251_v22 = vpack.c.bf16 %v864_v20, %v861_v19  ;;  %v876_v24 = vld [vmem:[%s807_s28 + $0x78] sm:$0xff] }
  0x14   : > { %703 = vmatmul.mubr.msk.bf16.vlgmr.msra.gmra.mxu0 %vm276_vm0, %v246_v9  ;;  %v252_v25 = vpack.c.bf16 %v876_v24, %v873_v23 }
  0x15   : > { %706 = vmatprep.mubr.msk.bf16.mxu0 %vm276_vm0, %v247_v10 }
  0x1c   : > { %707 = vmatmul.mubr.msk.bf16.gmra.mxu0 %vm276_vm0, %v248_v15 }
  0x1d   : > { %710 = vmatprep.mubr.msk.bf16.mxu0 %vm276_vm0, %v249_v16 }
  0x24   : > { %711 = vmatmul.mubr.msk.bf16.gmra.mxu0 %vm276_vm0, %v250_v21 }
  0x25   : > { %714 = vmatprep.mubr.msk.bf16.mxu0 %vm276_vm0, %v251_v22 }
  0x2c   : > { %715 = vmatmul.mubr.msk.bf16.gmra.mxu0 %vm276_vm0, %v252_v25 }
  0xd4   : > { %v704_v27 = vpop.f32.mrf.mxu0 }
  0xd5   : > { %v344_v33 = vadd.f32 %v704_v27, %v656_v29 }
  0xd6   : > { %v335_v28 = vpop.f32.mrf.mxu0 }
  0xd7   : > { %v336_v31 = vadd.f32 %v656_v29, %v335_v28  ;;  %v400_v40 = vmax.f32 %v344_v33, 0.0 }
  0xd8   : > { %v705_v30 = vpop.f32.mrf.mxu0 }
  0xd9   : > { %v347_v32 = vadd.f32 %v705_v30, %v656_v29  ;;  %v398_v38 = vmax.f32 %v336_v31, 0.0 }
  0xda   : > { %v338_v34 = vpop.f32.mrf.mxu0 }
  0xdb   : > { %v339_v35 = vadd.f32 %v656_v29, %v338_v34  ;;  %v401_v36 = vmax.f32 %v347_v32, 0.0 }
  0xdc   : > { %v708_v37 = vpop.f32.mrf.mxu0 }
  0xdd   : > { %v399_v39 = vmax.f32 %v339_v35, 0.0  ;;  %v415_v43 = vpack.c.bf16 %v401_v36, %v400_v40  ;;  %v360_v47 = vadd.f32 %v708_v37, %v656_v29  ;;  %v667_v37 = vld [vmem:[%s960_s4] ss:$0 sm:$0xff] }
  0xde   : > { %v351_v41 = vpop.f32.mrf.mxu0 }
  0xdf   : > { %v414_v42 = vpack.c.bf16 %v399_v39, %v398_v38  ;;  %v352_v45 = vadd.f32 %v656_v29, %v351_v41  ;;  %v404_v54 = vmax.f32 %v360_v47, 0.0 }
  0xe0   : > { %v709_v44 = vpop.f32.mrf.mxu0 }
  0xe1   : > { %v363_v46 = vadd.f32 %v709_v44, %v656_v29  ;;  %720 = vmatprep.mubr.msk.bf16.mxu1 %vm437_vm1, %v414_v42  ;;  %v402_v52 = vmax.f32 %v352_v45, 0.0 }
  0xe2   : > { %v354_v48 = vpop.f32.mrf.mxu0  ;;  %721 = vmatmul.mubr.msk.bf16.vlgmr.msra.gmra.mxu1 %vm437_vm1, %v415_v43 }
  0xe3   : > { %v355_v49 = vadd.f32 %v656_v29, %v354_v48  ;;  %v405_v50 = vmax.f32 %v363_v46, 0.0 }
  0xe4   : > { %v712_v51 = vpop.f32.mrf.mxu0 }
  0xe5   : > { %v403_v53 = vmax.f32 %v355_v49, 0.0  ;;  %v417_v57 = vpack.c.bf16 %v405_v50, %v404_v54  ;;  %v376_v61 = vadd.f32 %v712_v51, %v656_v29 }
  0xe6   : > { %v367_v55 = vpop.f32.mrf.mxu0 }
  0xe7   : > { %v416_v56 = vpack.c.bf16 %v403_v53, %v402_v52  ;;  %v368_v59 = vadd.f32 %v656_v29, %v367_v55  ;;  %v408_v10 = vmax.f32 %v376_v61, 0.0 }
  0xe8   : > { %v713_v58 = vpop.f32.mrf.mxu0 }
  0xe9   : > { %v379_v60 = vadd.f32 %v713_v58, %v656_v29  ;;  %724 = vmatprep.mubr.msk.bf16.mxu1 %vm437_vm1, %v416_v56  ;;  %v406_v5 = vmax.f32 %v368_v59, 0.0 }
  0xea   : > { %v370_v62 = vpop.f32.mrf.mxu0  ;;  %725 = vmatmul.mubr.msk.bf16.gmra.mxu1 %vm437_vm1, %v417_v57 }
  0xeb   : > { %v371_v63 = vadd.f32 %v656_v29, %v370_v62  ;;  %v409_v0 = vmax.f32 %v379_v60, 0.0 }
  0xec   : > { %v716_v1 = vpop.f32.mrf.mxu0 }
  0xed   : > { %v407_v9 = vmax.f32 %v371_v63, 0.0  ;;  %v419_v21 = vpack.c.bf16 %v409_v0, %v408_v10  ;;  %v392_v27 = vadd.f32 %v716_v1, %v656_v29 }
  0xee   : > { %v383_v15 = vpop.f32.mrf.mxu0 }
  0xef   : > { %v418_v16 = vpack.c.bf16 %v407_v9, %v406_v5  ;;  %v384_v25 = vadd.f32 %v656_v29, %v383_v15  ;;  %v412_v34 = vmax.f32 %v392_v27, 0.0 }
  0xf0   : > { %v717_v22 = vpop.f32.mrf.mxu0 }
  0xf1   : > { %v395_v26 = vadd.f32 %v717_v22, %v656_v29  ;;  %728 = vmatprep.mubr.msk.bf16.mxu1 %vm437_vm1, %v418_v16  ;;  %v410_v32 = vmax.f32 %v384_v25, 0.0 }
  0xf2   : > { %v386_v28 = vpop.f32.mrf.mxu0  ;;  %729 = vmatmul.mubr.msk.bf16.gmra.mxu1 %vm437_vm1, %v419_v21 }
  0xf3   : > { %v387_v30 = vadd.f32 %v656_v29, %v386_v28  ;;  %v413_v31 = vmax.f32 %v395_v26, 0.0 }
  0xf5   : > { %v411_v33 = vmax.f32 %v387_v30, 0.0  ;;  %v421_v36 = vpack.c.bf16 %v413_v31, %v412_v34 }
  0xf7   : > { %v420_v35 = vpack.c.bf16 %v411_v33, %v410_v32 }
  0xf9   : > { %732 = vmatprep.mubr.msk.bf16.mxu1 %vm437_vm1, %v420_v35 }
  0xfa   : > { %733 = vmatmul.mubr.msk.bf16.gmra.mxu1 %vm437_vm1, %v421_v36 }
 0x1a2   : > { %v722_v38 = vpop.f32.mrf.mxu1 }
 0x1a3   : > { %v505_v39 = vadd.f32 %v722_v38, %v667_v37 }
 0x1a4   : > { %v496_v29 = vpop.f32.mrf.mxu1 }
 0x1a5   : > { %v561_v40 = vadd.f32 %v505_v39, %v816_v4  ;;  %v497_v41 = vadd.f32 %v667_v37, %v496_v29 }
 0x1a6   : > { %v723_v42 = vpop.f32.mrf.mxu1 }
 0x1a7   : > { %577 = vst.msk [vmem:[%s903_s12 + $0x10] sm:$0xff] %vm276_vm0, %v561_v40  ;;  %v559_v43 = vadd.f32 %v497_v41, %v810_v2  ;;  %v508_v44 = vadd.f32 %v723_v42, %v667_v37 }
 0x1a8   : > { %v499_v45 = vpop.f32.mrf.mxu1 }
 0x1a9   : > { %575 = vst.msk [vmem:[%s903_s12] sm:$0xff] %vm276_vm0, %v559_v43  ;;  %v562_v46 = vadd.f32 %v508_v44, %v821_v6  ;;  %v500_v47 = vadd.f32 %v667_v37, %v499_v45 }
 0x1aa   : > { %v726_v48 = vpop.f32.mrf.mxu1 }
 0x1ab   : > { %578 = vst.msk [vmem:[%s903_s12 + $0x18] sm:$0xff] %vm276_vm0, %v562_v46  ;;  %v560_v4 = vadd.f32 %v500_v47, %v813_v3  ;;  %v521_v49 = vadd.f32 %v726_v48, %v667_v37 }
 0x1ac   : > { %v512_v50 = vpop.f32.mrf.mxu1 }
 0x1ad   : > { %576 = vst.msk [vmem:[%s903_s12 + $0x8] sm:$0xff] %vm276_vm0, %v560_v4  ;;  %v565_v2 = vadd.f32 %v521_v49, %v837_v11  ;;  %v513_v51 = vadd.f32 %v667_v37, %v512_v50 }
 0x1ae   : > { %v727_v52 = vpop.f32.mrf.mxu1 }
 0x1af   : > { %581 = vst.msk [vmem:[%s903_s12 + $0x30] sm:$0xff] %vm276_vm0, %v565_v2  ;;  %v563_v6 = vadd.f32 %v513_v51, %v824_v7  ;;  %v524_v53 = vadd.f32 %v727_v52, %v667_v37 }
 0x1b0   : > { %v515_v54 = vpop.f32.mrf.mxu1 }
 0x1b1   : > { %579 = vst.msk [vmem:[%s903_s12 + $0x20] sm:$0xff] %vm276_vm0, %v563_v6  ;;  %v566_v3 = vadd.f32 %v524_v53, %v840_v12  ;;  %v516_v55 = vadd.f32 %v667_v37, %v515_v54 }
 0x1b2   : > { %v730_v56 = vpop.f32.mrf.mxu1 }
 0x1b3   : > { %582 = vst.msk [vmem:[%s903_s12 + $0x38] sm:$0xff] %vm276_vm0, %v566_v3  ;;  %v564_v11 = vadd.f32 %v516_v55, %v827_v8  ;;  %v537_v57 = vadd.f32 %v730_v56, %v667_v37 }
 0x1b4   : > { %v528_v58 = vpop.f32.mrf.mxu1 }
 0x1b5   : > { %580 = vst.msk [vmem:[%s903_s12 + $0x28] sm:$0xff] %vm276_vm0, %v564_v11  ;;  %v569_v7 = vadd.f32 %v537_v57, %v855_v17  ;;  %v529_v59 = vadd.f32 %v667_v37, %v528_v58 }
 0x1b6   : > { %v731_v60 = vpop.f32.mrf.mxu1 }
 0x1b7   : > { %585 = vst.msk [vmem:[%s903_s12 + $0x50] sm:$0xff] %vm276_vm0, %v569_v7  ;;  %v567_v12 = vadd.f32 %v529_v59, %v843_v13  ;;  %v540_v61 = vadd.f32 %v731_v60, %v667_v37 }
 0x1b8   : > { %v531_v62 = vpop.f32.mrf.mxu1 }
 0x1b9   : > { %583 = vst.msk [vmem:[%s903_s12 + $0x40] sm:$0xff] %vm276_vm0, %v567_v12  ;;  %v570_v8 = vadd.f32 %v540_v61, %v858_v18  ;;  %v532_v63 = vadd.f32 %v667_v37, %v531_v62 }
 0x1ba   : > { %v734_v0 = vpop.f32.mrf.mxu1 }
 0x1bb   : > { %586 = vst.msk [vmem:[%s903_s12 + $0x58] sm:$0xff] %vm276_vm0, %v570_v8  ;;  %v568_v17 = vadd.f32 %v532_v63, %v846_v14  ;;  %v553_v1 = vadd.f32 %v734_v0, %v667_v37 }
 0x1bc   : > { %v544_v5 = vpop.f32.mrf.mxu1 }
 0x1bd   : > { %584 = vst.msk [vmem:[%s903_s12 + $0x48] sm:$0xff] %vm276_vm0, %v568_v17  ;;  %v573_v13 = vadd.f32 %v553_v1, %v873_v23  ;;  %v545_v9 = vadd.f32 %v667_v37, %v544_v5 }
 0x1be   : > { %v735_v10 = vpop.f32.mrf.mxu1 }
 0x1bf   : > { %589 = vst.msk [vmem:[%s903_s12 + $0x70] sm:$0xff] %vm276_vm0, %v573_v13  ;;  %v571_v18 = vadd.f32 %v545_v9, %v861_v19  ;;  %v556_v15 = vadd.f32 %v735_v10, %v667_v37 }
 0x1c0   : > { %v547_v16 = vpop.f32.mrf.mxu1 }
 0x1c1   : > { %587 = vst.msk [vmem:[%s903_s12 + $0x60] sm:$0xff] %vm276_vm0, %v571_v18  ;;  %v574_v21 = vadd.f32 %v556_v15, %v876_v24  ;;  %v548_v14 = vadd.f32 %v667_v37, %v547_v16 }
 0x1c3   : > { %590 = vst.msk [vmem:[%s903_s12 + $0x78] sm:$0xff] %vm276_vm0, %v574_v21  ;;  %v572_v22 = vadd.f32 %v548_v14, %v864_v20 }
 0x1c5   : > { %588 = vst.msk [vmem:[%s903_s12 + $0x68] sm:$0xff] %vm276_vm0, %v572_v22 }
 0x1c6 PF: > { %s15_s18 = sadd.s32 1, %s753_s18  }
 0x1c7   : > { %p12_p4 = scmp.ge.s32.totalorder %s15_s18, 10  }
 0x1c9   :  { %14 = sbr.rel (!%p12_p4) target bundleno = 1 (0x1), region = 70 }

</bundles_post_ra>
